<compile_context>
chip_gen: v7x
topology: tpu7x:2x2x1
jax: 0.10.0
libtpu: 0.0.40
codegen_flags: <defaults>
</compile_context>

<pallas_src>
import jax
import jax.numpy as jnp
from jax.experimental import pallas as pl
from jax.experimental.pallas import tpu as pltpu


def _decoder_kernel(z_ref, w_ref, b_ref, o_ref):
    # z_ref : (tm, K)   activations
    # w_ref : (K, tn)   weight, pre-transposed to (in, out) -> lane-dense tile
    # b_ref : (1, tn)   bias slice
    # o_ref : (tm, tn)  output tile
    acc = jnp.dot(z_ref[...], w_ref[...], preferred_element_type=jnp.float32)
    acc = acc + b_ref[...]                      # broadcast over rows, f32
    o_ref[...] = jax.nn.sigmoid(acc).astype(o_ref.dtype)


def _pick_tile(dim, pref, align):
    """Largest tile <= pref that is a multiple of `align`, or the full dim."""
    if dim <= pref:
        return dim
    return (pref // align) * align


@jax.jit
def decoder_forward(z, weight, bias):
    """Equivalent of torch.sigmoid(self.fc1(z)).

    z      : (B, latent_dim) float32
    weight : (input_dim, latent_dim) float32   -- PyTorch nn.Linear layout
    bias   : (input_dim,) float32
    returns: (B, input_dim) float32
    """
    B, latent_dim = z.shape
    input_dim = weight.shape[0]

    # One-time cheap transpose (2*N*K bytes of HBM, negligible vs the B*N
    # output) so the kernel-side weight tile is lane-dense along input_dim.
    w_t = weight.T                       # (latent_dim, input_dim)
    b2 = bias.reshape(1, input_dim)      # 2-D for clean VMEM layout

    # Tile sizes: tm multiple of 8 (or full B), tn multiple of 128 (or full N).
    # Double-buffered footprint at (512, 2048) f32 is ~9-10 MiB: fits all of
    # v5e/v6e/v7x once the scoped-VMEM limit is raised below.
    tm = _pick_tile(B, 512, 8)
    tn = _pick_tile(input_dim, 2048, 128)

    # Output-feature axis OUTER, batch INNER: weight/bias block indices are
    # constant across the inner loop -> each weight column block is DMA'd once.
    grid = (pl.cdiv(input_dim, tn), pl.cdiv(B, tm))

    out = pl.pallas_call(
        _decoder_kernel,
        out_shape=jax.ShapeDtypeStruct((B, input_dim), z.dtype),
        grid=grid,
        in_specs=[
            pl.BlockSpec((tm, latent_dim), lambda j, i: (i, 0)),   # z rows
            pl.BlockSpec((latent_dim, tn), lambda j, i: (0, j)),   # weight cols
            pl.BlockSpec((1, tn), lambda j, i: (0, j)),            # bias slice
        ],
        out_specs=pl.BlockSpec((tm, tn), lambda j, i: (i, j)),
        compiler_params=pltpu.CompilerParams(
            dimension_semantics=("parallel", "parallel"),
            vmem_limit_bytes=64 << 20,
        ),
    )(z, w_t, b2)
    return out


def init_decoder_params(key, latent_dim, input_dim):
    """Deterministic init matching nn.Linear's default uniform(-1/sqrt(fan_in), +)."""
    k_w, k_b = jax.random.split(key)
    bound = 1.0 / jnp.sqrt(jnp.float32(latent_dim))
    weight = jax.random.uniform(
        k_w, (input_dim, latent_dim), jnp.float32, minval=-bound, maxval=bound
    )
    bias = jax.random.uniform(
        k_b, (input_dim,), jnp.float32, minval=-bound, maxval=bound
    )
    return weight, bias


if __name__ == "__main__":
    # Small shapes consistent with the module: Decoder(hidden_dim, latent_dim, input_dim)
    batch = 8
    hidden_dim = 64      # unused by forward (kept for signature parity)
    latent_dim = 32
    input_dim = 128

    key = jax.random.PRNGKey(0)
    k_z, k_p = jax.random.split(key)
    z = jax.random.normal(k_z, (batch, latent_dim), dtype=jnp.float32)
    weight, bias = init_decoder_params(k_p, latent_dim, input_dim)

    out = decoder_forward(z, weight, bias)
    out = jax.block_until_ready(out)

    # Reference check in plain JAX (same math as torch.sigmoid(fc1(z))).
    ref = jax.nn.sigmoid(z @ weight.T + bias)
    assert out.shape == (batch, input_dim)
    assert jnp.allclose(out, ref, atol=1e-5, rtol=1e-5)

    print("KERNEL_OK")
</pallas_src>

<mosaic_0001>
module attributes {stable_mosaic.version = 11 : i64} {
  func.func @_decoder_kernel(%arg0: i32, %arg1: i32, %arg2: memref<8x32xf32, #tpu.memory_space<vmem>>, %arg3: memref<32x128xf32, #tpu.memory_space<vmem>>, %arg4: memref<1x128xf32, #tpu.memory_space<vmem>>, %arg5: memref<8x128xf32, #tpu.memory_space<vmem>>) attributes {dimension_semantics = [#tpu.dimension_semantics<parallel>, #tpu.dimension_semantics<parallel>], iteration_bounds = array<i64: 1, 1>, scalar_prefetch = 0 : i64, scratch_operands = 0 : i64, tpu.core_type = #tpu.core_type<tc>, window_params = [{transform_indices = @transform_0, window_bounds = array<i64: 8, 32>}, {transform_indices = @transform_1, window_bounds = array<i64: 32, 128>}, {transform_indices = @transform_2, window_bounds = array<i64: 1, 128>}, {transform_indices = @transform_3, window_bounds = array<i64: 8, 128>}]} {
    %c0 = arith.constant 0 : index
    %c0_0 = arith.constant 0 : index
    %0 = vector.load %arg2[%c0, %c0_0] : memref<8x32xf32, #tpu.memory_space<vmem>>, vector<8x32xf32>
    %c0_1 = arith.constant 0 : index
    %c0_2 = arith.constant 0 : index
    %1 = vector.load %arg3[%c0_1, %c0_2] : memref<32x128xf32, #tpu.memory_space<vmem>>, vector<32x128xf32>
    %cst = arith.constant dense<0.000000e+00> : vector<8x128xf32>
    %2 = tpu.matmul %0, %1, %cst {dimension_numbers = #tpu.dot_dimension_numbers<[1], [0], [0], [1], [0, 0, 1, 1], [], []>} : vector<8x32xf32>, vector<32x128xf32>, vector<8x128xf32> -> vector<8x128xf32>
    %c0_3 = arith.constant 0 : index
    %c0_4 = arith.constant 0 : index
    %3 = vector.load %arg4[%c0_3, %c0_4] : memref<1x128xf32, #tpu.memory_space<vmem>>, vector<1x128xf32>
    %4 = vector.broadcast %3 : vector<1x128xf32> to vector<8x128xf32>
    %5 = arith.addf %2, %4 : vector<8x128xf32>
    %6 = arith.negf %5 : vector<8x128xf32>
    %7 = math.exp %6 : vector<8x128xf32>
    %cst_5 = arith.constant 1.000000e+00 : f32
    %8 = vector.broadcast %cst_5 : f32 to vector<8x128xf32>
    %9 = arith.addf %8, %7 : vector<8x128xf32>
    %10 = arith.divf %8, %9 : vector<8x128xf32>
    %c0_6 = arith.constant 0 : index
    %c0_7 = arith.constant 0 : index
    %11 = vector.load %arg5[%c0_6, %c0_7] : memref<8x128xf32, #tpu.memory_space<vmem>>, vector<8x128xf32>
    tpu.vector_store %arg5[%c0_6, %c0_7], %10 {strides = array<i32>} : memref<8x128xf32, #tpu.memory_space<vmem>>, vector<8x128xf32>,
    return
  }
  func.func @transform_0(%arg0: i32, %arg1: i32) -> (i32, i32) {
    %c0_i32 = arith.constant 0 : i32
    %c0_i32_0 = arith.constant 0 : i32
    return %arg1, %c0_i32 : i32, i32
  }
  func.func @transform_1(%arg0: i32, %arg1: i32) -> (i32, i32) {
    %c0_i32 = arith.constant 0 : i32
    %c0_i32_0 = arith.constant 0 : i32
    return %c0_i32, %arg0 : i32, i32
  }
  func.func @transform_2(%arg0: i32, %arg1: i32) -> (i32, i32) {
    %c0_i32 = arith.constant 0 : i32
    %c0_i32_0 = arith.constant 0 : i32
    return %c0_i32, %arg0 : i32, i32
  }
  func.func @transform_3(%arg0: i32, %arg1: i32) -> (i32, i32) {
    %c0_i32 = arith.constant 0 : i32
    return %arg1, %arg0 : i32, i32
  }
}

</mosaic_0001>

<bundles_post_ra>
// kernel: decoder_forward.1
= control target key start
LH: loop header
LB: loop body
LE: loop exit
PB: predicated region body
PF: predicated region fallthrough
CT: control target
= control target key end

     0   :  { %8 = vsyncpa [#allocation3], 0  ;;  %s370_s0 = inlined_call_operand.hbm [shape: f32[8,32], index: 0, kind: input, shape index: {}]   ;;  %s371_s1 = inlined_call_operand.hbm [shape: f32[32,128], index: 1, kind: input, shape index: {}]   ;;  %s372_s2 = inlined_call_operand.hbm [shape: f32[1,128], index: 2, kind: input, shape index: {}]   ;;  %s373_s3 = inlined_call_operand.hbm [shape: f32[8,128], index: 3, kind: output, shape index: {}]  }
   0x1   :  { %9 = vsyncpa [#allocation6], 0 }
   0x2   :  { %10 = vsyncpa [#allocation4], 0  ;;  %s293_s12 = smov [#allocation5]   ;;  %s199_s16 = scalar_lea.hbm %s371_s1, 512 }
   0x3   :  { %s26_s13 = sshll.u32 %s293_s12, 4  ;;  %p200_p0 = scmp.ne.s32.totalorder %s371_s1, %s199_s16  ;;  %s27_s13 = int_to_ptr.vmem [resolvable:$true] %s26_s13 }
   0x4   :  { %p203_p1 = scmp.lt.u32.totalorder %s199_s16, %s371_s1 }
   0x6   :  { %p205_p2 = pnand %p203_p1, %p200_p0 }
   0x8   :  { %208 = shalt.err (!%p205_p2)
}
   0x9   :  { %s209_s21 = scalar_lea.vmem %s27_s13, 512  ;;  %p214_p4 = scmp.lt.s32.totalorder %s27_s13, %s27_s13 }
   0xa   :  { %p210_p3 = scmp.ne.s32.totalorder %s27_s13, %s209_s21  ;;  %p215_p5 = scmp.lt.s32.totalorder %s209_s21, %s209_s21 }
   0xc   :  { %p216_p6 = por %p215_p5, %p214_p4 }
   0xe   :  { %p217_p7 = pnand %p216_p6, %p210_p3 }
  0x10   :  { %220 = shalt.err (!%p217_p7)
}
  0x11   :  { %s294_s22 = smov 128   ;;  %s295_s23 = smov 8  }
  0x12   :  { %32 = dma.hbm_to_vmem [thread:$0]  %s371_s1, 512, %s27_s13, [#allocation6], %s294_s22, %s294_s22, %s295_s23  }
  0x13   :  { %s296_s26 = smov [#allocation2]   ;;  %s297_s28 = smov [#allocation7]  }
  0x14   :  { %s17_s27 = sshll.u32 %s296_s26, 4  ;;  %s39_s29 = sshll.u32 %s297_s28, 4  ;;  %s18_s27 = int_to_ptr.vmem [resolvable:$true] %s17_s27  ;;  %s40_s29 = int_to_ptr.vmem [resolvable:$true] %s39_s29 }
  0x15   :  { %s221_s5 = scalar_lea.hbm %s370_s0, 128 }
  0x16   :  { %p222_p8 = scmp.ne.s32.totalorder %s370_s0, %s221_s5  ;;  %p225_p9 = scmp.lt.u32.totalorder %s221_s5, %s370_s0 }
  0x18   :  { %p227_p10 = pnand %p225_p9, %p222_p8 }
  0x1a   :  { %230 = shalt.err (!%p227_p10)
}
  0x1b   :  { %s231_s1 = scalar_lea.vmem %s18_s27, 128  ;;  %p236_p12 = scmp.lt.s32.totalorder %s18_s27, %s18_s27 }
  0x1c   :  { %p232_p11 = scmp.ne.s32.totalorder %s18_s27, %s231_s1  ;;  %p237_p13 = scmp.lt.s32.totalorder %s231_s1, %s231_s1 }
  0x1e   :  { %p238_p0 = por %p237_p13, %p236_p12 }
  0x20   :  { %p239_p1 = pnand %p238_p0, %p232_p11 }
  0x22   :  { %242 = shalt.err (!%p239_p1)
}
  0x23   :  { %20 = dma.hbm_to_vmem [thread:$0]  %s370_s0, 128, %s18_s27, [#allocation3]  }
  0x24   :  { %s243_s14 = scalar_lea.hbm %s372_s2, 16 }
  0x25   :  { %p244_p2 = scmp.ne.s32.totalorder %s372_s2, %s243_s14  ;;  %p247_p3 = scmp.lt.u32.totalorder %s243_s14, %s372_s2 }
  0x27   :  { %p249_p4 = pnand %p247_p3, %p244_p2 }
  0x29   :  { %252 = shalt.err (!%p249_p4)
}
  0x2a   :  { %s253_s19 = scalar_lea.vmem %s40_s29, 16  ;;  %s257_s20 = scalar_lea.vmem %s40_s29, 32 }
  0x2b   :  { %p254_p5 = scmp.ne.s32.totalorder %s40_s29, %s253_s19  ;;  %p258_p6 = scmp.lt.s32.totalorder %s40_s29, %s40_s29 }
  0x2c   :  { %p259_p7 = scmp.lt.s32.totalorder %s257_s20, %s253_s19 }
  0x2e   :  { %p260_p8 = por %p259_p7, %p258_p6 }
  0x30   :  { %p261_p9 = pnand %p260_p8, %p254_p5 }
  0x32   :  { %264 = shalt.err (!%p261_p9)
}
  0x33   :  { %42 = dma.hbm_to_vmem [thread:$0]  %s372_s2, 16, %s40_s29, [#allocation6]  }
  0x34   :  { %287 = dma.done.wait [#allocation3], 128  }
  0x35   :  { %288 = vsyncadd [#allocation3], 4294967168 }
  0x36   :  { %289 = dma.done.wait [#allocation6], 528  }
  0x37   :  { %290 = vsyncadd [#allocation6], 4294966768  ;;  %v298_v0 = vmov 0.0|0.0   ;;  %vm299_vm0 = vmmov 0   ;;  %v300_v1 = vmov 0.0   ;;  %v53_v2 = vld [vmem:[#allocation5] sm:$0xff] }
  0x38   :  { %180 = vmatprep.subr.bf16.mxu0 %v298_v0  ;;  %177 = vmatprep.mubr.msk.f32.mxu0 %vm299_vm0, %v300_v1  ;;  %v54_v3 = vld [vmem:[#allocation5 + $0x8] sm:$0xff]  ;;  %v55_v4 = vld [vmem:[#allocation5 + $0x10] sm:$0xff]  ;;  %v56_v6 = vld [vmem:[#allocation5 + $0x18] sm:$0xff]  ;;  %vm64_vm1 = vcmask 261120   ;;  %s301_s2 = smov [#allocation8]  }
  0x39   :  { %v181_v5 = vpack.c.bf16 %v54_v3, %v53_v2  ;;  %v184_v7 = vpack.c.bf16 %v56_v6, %v55_v4  ;;  %v52_v8 = vld [vmem:[#allocation2] sm:$0xff]  ;;  %v161_v9 = vld [vmem:[#allocation7] ss:$0 sm:$0xff]  ;;  %s151_s22 = sshll.u32 %s301_s2, 4  ;;  %s152_s22 = int_to_ptr.vmem [resolvable:$true] %s151_s22 }
  0x3a   :  { %s265_s23 = scalar_lea.vmem %s152_s22, 128  ;;  %p270_p11 = scmp.lt.s32.totalorder %s152_s22, %s152_s22 }
  0x3b   :  { %182 = vmatpush3.bf16.msra.mxu0 %v181_v5  ;;  %p266_p10 = scmp.ne.s32.totalorder %s152_s22, %s265_s23  ;;  %p271_p12 = scmp.lt.s32.totalorder %s265_s23, %s265_s23 }
  0x3c   :  { %183 = vmatprep.subr.bf16.mxu0 %v298_v0 }
  0x3d   :  { %p272_p13 = por %p271_p12, %p270_p11 }
  0x3f   :  { %185 = vmatpush3.bf16.msra.mxu0 %v184_v7  ;;  %p273_p0 = pnand %p272_p13, %p266_p10 }
  0x42   :  { %178 = vmatmul.mubr.msk.f32.vlgmr.msra.gmra.mrb[0].mxu0 %vm64_vm1, %v52_v8 }
 0x115   :  { %v134_v10 = vpop.f32.mrb[0].mxu0 }
 0x116   :  { %v135_v11 = vadd.f32 %v161_v9, %v134_v10  ;;  %v179_v12 = vpop.f32.mrb[1].mxu0 }
 0x118   :  { %v163_v13 = vmul.f32 -1.442695, %v135_v11 }
 0x11a   :  { %195 = vpow2.f32 %v163_v13 }
 0x124   :  { %v196_v14 = vpop.eup %195 }
 0x125   :  { %v141_v15 = vadd.f32 1.0, %v196_v14 }
 0x127   :  { %197 = vrcp.f32 %v141_v15 }
 0x131   :  { %v198_v16 = vpop.eup %197 }
 0x132   :  { %144 = vst [vmem:[#allocation8] sm:$0xff] %v198_v16 }
 0x133   :  { %276 = shalt.err (!%p273_p0)
}
 0x134   :  { %s277_s26 = scalar_lea.hbm %s373_s3, 128 }
 0x135   :  { %p278_p1 = scmp.ne.s32.totalorder %s373_s3, %s277_s26  ;;  %p281_p2 = scmp.lt.u32.totalorder %s277_s26, %s373_s3 }
 0x137   :  { %p283_p3 = pnand %p281_p2, %p278_p1 }
 0x139   :  { %286 = shalt.err (!%p283_p3)
}
 0x13a   :  { %154 = dma.vmem_to_hbm [thread:$0]  %s152_s22, 128, %s373_s3, [#allocation4]  }
 0x13b   :  { %291 = dma.done.wait [#allocation4], 128  }
 0x13c   :  { %292 = vsyncadd [#allocation4], 4294967168 }
 0x13d   :  { %158 = vsyncpa [#allocation3], 1 }
 0x13e   :  { %159 = vsyncpa [#allocation6], 1 }
 0x13f   :  { %160 = vsyncpa [#allocation4], 1 }

</bundles_post_ra>
